<compile_context>
chip_gen: v7x
topology: tpu7x:2x2x1
jax: 0.10.0
libtpu: 0.0.40
codegen_flags: <defaults>
</compile_context>

<pallas_src>
import functools

import numpy as np
import jax
import jax.numpy as jnp
from jax.experimental import pallas as pl
from jax.experimental.pallas import tpu as pltpu


def _round_up(x, m):
    return (x + m - 1) // m * m


def critic_kernel(xa_ref, w1_ref, w2a_ref, w2b_ref, w3_ref,
                  b1_ref, b2_ref, b3_ref, out_ref, *, in1):
    # xa_ref: (IN1+IN2A, TB) bf16, feature-major so the batch is on lanes.
    s = xa_ref[:in1, :]                      # (IN1,  TB) bf16  (state^T)
    a = xa_ref[in1:, :]                      # (IN2A, TB) bf16  (action^T)

    # fcs1 + ReLU :  xs^T = relu(W1 @ state^T + b1)
    xs = jnp.dot(w1_ref[...], s, preferred_element_type=jnp.float32) + b1_ref[...]
    xs = jnp.maximum(xs, 0.0).astype(jnp.bfloat16)          # (H0, TB)

    # fc2 on cat(xs, action) + ReLU  (concat folded into two matmuls)
    h = (jnp.dot(w2a_ref[...], xs, preferred_element_type=jnp.float32)
         + jnp.dot(w2b_ref[...], a, preferred_element_type=jnp.float32)
         + b2_ref[...])
    h = jnp.maximum(h, 0.0)                                  # (H1, TB) f32

    # fc3 (output width 1): VPU multiply + sublane reduce instead of an
    # MXU matmul that would use a single result lane.
    q = jnp.sum(h * w3_ref[...], axis=0, keepdims=True) + b3_ref[0]   # (1, TB)
    out_ref[...] = q.astype(out_ref.dtype)


def critic_forward(state, action, params, *, tb=1024):
    """state: (B, state_size*2) f32, action: (B, action_size*2) f32 -> (B, 1) f32."""
    B = state.shape[0]
    in1 = state.shape[1]
    in2a = action.shape[1]

    w1, w2a, w2b = params["w1"], params["w2a"], params["w2b"]
    w3, b1, b2, b3 = params["w3"], params["b1"], params["b2"], params["b3"]
    h0, h1 = w1.shape[0], w2a.shape[0]

    # Pack [state | action] into a single feature-major bf16 slab (batch on lanes).
    xa = jnp.concatenate([state, action], axis=1).astype(jnp.bfloat16).T  # (in1+in2a, B)

    tb_eff = min(tb, _round_up(B, 128))          # lane-dense tile, bounded VMEM
    b_pad = _round_up(B, tb_eff)
    if b_pad != B:
        xa = jnp.pad(xa, ((0, 0), (0, b_pad - B)))
    grid = (b_pad // tb_eff,)

    flops = 2 * B * (in1 * h0 + (h0 + in2a) * h1 + h1)
    bytes_accessed = int(xa.size * 2 + b_pad * 4
                         + (w1.size + w2a.size + w2b.size) * 2
                         + (w3.size + b1.size + b2.size + 1) * 4)

    out = pl.pallas_call(
        functools.partial(critic_kernel, in1=in1),
        out_shape=jax.ShapeDtypeStruct((1, b_pad), jnp.float32),
        grid=grid,
        in_specs=[
            # batch-tiled, pipelined input slab
            pl.BlockSpec((in1 + in2a, tb_eff), lambda i: (0, i)),
            # weights / biases: constant index_map -> DMA'd once, VMEM-resident
            pl.BlockSpec(w1.shape, lambda i: (0, 0)),
            pl.BlockSpec(w2a.shape, lambda i: (0, 0)),
            pl.BlockSpec(w2b.shape, lambda i: (0, 0)),
            pl.BlockSpec(w3.shape, lambda i: (0, 0)),
            pl.BlockSpec(b1.shape, lambda i: (0, 0)),
            pl.BlockSpec(b2.shape, lambda i: (0, 0)),
            # scalar output bias lives in SMEM (no padded VMEM tile / extra DMA buffer)
            pl.BlockSpec(memory_space=pltpu.MemorySpace.SMEM),
        ],
        out_specs=pl.BlockSpec((1, tb_eff), lambda i: (0, i)),   # lane-dense output
        compiler_params=pltpu.CompilerParams(
            dimension_semantics=("parallel",)),                  # 2x on v7x megacore
        cost_estimate=pl.CostEstimate(
            flops=flops, transcendentals=0, bytes_accessed=bytes_accessed),
    )(xa, w1, w2a, w2b, w3, b1, b2, b3)

    return out[0, :B][:, None]                   # (B, 1); pure layout reshape


def init_critic_params(key, state_size, action_size, hidden_units):
    """Deterministic init mirroring Critic.reset_parameters().
    Note: hidden_init uses weight.size()[0] == out_features (intentional
    PyTorch-quirk mirror -- do not 'fix' to true fan_in)."""
    h0, h1 = hidden_units
    in1 = state_size * 2
    in2a = action_size * 2
    in2 = h0 + in2a

    k1, k2, k3, kb1, kb2, kb3 = jax.random.split(key, 6)

    lim1 = 1.0 / np.sqrt(h0)
    lim2 = 1.0 / np.sqrt(h1)
    lim3 = 0.003

    # Weights in PyTorch [out, in] orientation (kernel computes W @ x^T).
    w1 = jax.random.uniform(k1, (h0, in1), jnp.float32, -lim1, lim1)
    w2 = jax.random.uniform(k2, (h1, in2), jnp.float32, -lim2, lim2)
    w3 = jax.random.uniform(k3, (1, h1), jnp.float32, -lim3, lim3)

    # nn.Linear default bias init: U(-1/sqrt(fan_in), 1/sqrt(fan_in)), true fan_in.
    b1 = jax.random.uniform(kb1, (h0, 1), jnp.float32,
                            -1.0 / np.sqrt(in1), 1.0 / np.sqrt(in1))
    b2 = jax.random.uniform(kb2, (h1, 1), jnp.float32,
                            -1.0 / np.sqrt(in2), 1.0 / np.sqrt(in2))
    b3 = jax.random.uniform(kb3, (1,), jnp.float32,
                            -1.0 / np.sqrt(h1), 1.0 / np.sqrt(h1))

    return {
        # bf16 weights on the MXU path (halves HBM traffic, native MXU dtype)
        "w1": w1.astype(jnp.bfloat16),
        "w2a": w2[:, :h0].astype(jnp.bfloat16),
        "w2b": w2[:, h0:].astype(jnp.bfloat16),
        # f32 column vector for the VPU fc3 path
        "w3": w3.T,
        "b1": b1, "b2": b2, "b3": b3,
    }


def critic_ref(state, action, params):
    """Pure-JAX reference of the PyTorch forward (same bf16-stored weights)."""
    w1 = params["w1"].astype(jnp.float32)      # (H0, IN1)
    w2a = params["w2a"].astype(jnp.float32)    # (H1, H0)
    w2b = params["w2b"].astype(jnp.float32)    # (H1, IN2A)
    xs = jax.nn.relu(state @ w1.T + params["b1"][:, 0])
    h = jax.nn.relu(xs @ w2a.T + action @ w2b.T + params["b2"][:, 0])
    return h @ params["w3"] + params["b3"]     # (B, 1)


if __name__ == "__main__":
    state_size = 8       # module consumes state_size*2 = 16 features
    action_size = 4      # module consumes action_size*2 = 8 features
    hidden_units = (32, 32)
    batch = 8

    key = jax.random.PRNGKey(0)
    kp, ks, ka = jax.random.split(key, 3)

    params = init_critic_params(kp, state_size, action_size, hidden_units)
    state = jax.random.normal(ks, (batch, state_size * 2), jnp.float32)
    action = jax.random.normal(ka, (batch, action_size * 2), jnp.float32)

    q = critic_forward(state, action, params)
    jax.block_until_ready(q)

    q_ref = critic_ref(state, action, params)
    # bf16 activations -> loosened tolerance vs f32 reference.
    np.testing.assert_allclose(np.asarray(q), np.asarray(q_ref),
                               rtol=1e-2, atol=2e-3)

    print("KERNEL_OK")
</pallas_src>

<mosaic_0001>
module attributes {stable_mosaic.version = 11 : i64} {
  func.func @critic_kernel(%arg0: i32, %arg1: memref<24x128xbf16, #tpu.memory_space<vmem>>, %arg2: memref<32x16xbf16, #tpu.memory_space<vmem>>, %arg3: memref<32x32xbf16, #tpu.memory_space<vmem>>, %arg4: memref<32x8xbf16, #tpu.memory_space<vmem>>, %arg5: memref<32x1xf32, #tpu.memory_space<vmem>>, %arg6: memref<32x1xf32, #tpu.memory_space<vmem>>, %arg7: memref<32x1xf32, #tpu.memory_space<vmem>>, %arg8: memref<1xf32, #tpu.memory_space<smem>>, %arg9: memref<1x128xf32, #tpu.memory_space<vmem>>) attributes {dimension_semantics = [#tpu.dimension_semantics<parallel>], iteration_bounds = array<i64: 1>, scalar_prefetch = 0 : i64, scratch_operands = 0 : i64, tpu.core_type = #tpu.core_type<tc>, window_params = [{transform_indices = @transform_0, window_bounds = array<i64: 24, 128>}, {pipeline_mode = #tpu.pipeline_mode<synchronous>, transform_indices = @transform_1, window_bounds = array<i64: 32, 16>}, {pipeline_mode = #tpu.pipeline_mode<synchronous>, transform_indices = @transform_2, window_bounds = array<i64: 32, 32>}, {pipeline_mode = #tpu.pipeline_mode<synchronous>, transform_indices = @transform_3, window_bounds = array<i64: 32, 8>}, {pipeline_mode = #tpu.pipeline_mode<synchronous>, transform_indices = @transform_4, window_bounds = array<i64: 32, 1>}, {pipeline_mode = #tpu.pipeline_mode<synchronous>, transform_indices = @transform_5, window_bounds = array<i64: 32, 1>}, {pipeline_mode = #tpu.pipeline_mode<synchronous>, transform_indices = @transform_6, window_bounds = array<i64: 32, 1>}, {transform_indices = @transform_7, window_bounds = array<i64: 1>}, {transform_indices = @transform_8, window_bounds = array<i64: 1, 128>}]} {
    %c0 = arith.constant 0 : index
    %c0_0 = arith.constant 0 : index
    %0 = vector.load %arg1[%c0, %c0_0] : memref<24x128xbf16, #tpu.memory_space<vmem>>, vector<16x128xbf16>
    %c16 = arith.constant 16 : index
    %c0_1 = arith.constant 0 : index
    %1 = vector.load %arg1[%c16, %c0_1] : memref<24x128xbf16, #tpu.memory_space<vmem>>, vector<8x128xbf16>
    %c0_2 = arith.constant 0 : index
    %c0_3 = arith.constant 0 : index
    %2 = vector.load %arg2[%c0_2, %c0_3] : memref<32x16xbf16, #tpu.memory_space<vmem>>, vector<32x16xbf16>
    %cst = arith.constant dense<0.000000e+00> : vector<32x128xf32>
    %3 = tpu.matmul %2, %0, %cst {dimension_numbers = #tpu.dot_dimension_numbers<[1], [0], [0], [1], [0, 0, 1, 1], [], []>} : vector<32x16xbf16>, vector<16x128xbf16>, vector<32x128xf32> -> vector<32x128xf32>
    %c0_4 = arith.constant 0 : index
    %c0_5 = arith.constant 0 : index
    %4 = vector.load %arg6[%c0_4, %c0_5] : memref<32x1xf32, #tpu.memory_space<vmem>>, vector<32x1xf32>
    %5 = vector.broadcast %4 : vector<32x1xf32> to vector<32x128xf32>
    %6 = arith.addf %3, %5 : vector<32x128xf32>
    %cst_6 = arith.constant 0.000000e+00 : f32
    %7 = vector.broadcast %cst_6 : f32 to vector<32x128xf32>
    %8 = arith.maximumf %6, %7 : vector<32x128xf32>
    %9 = arith.truncf %8 : vector<32x128xf32> to vector<32x128xbf16>
    %c0_7 = arith.constant 0 : index
    %c0_8 = arith.constant 0 : index
    %10 = vector.load %arg3[%c0_7, %c0_8] : memref<32x32xbf16, #tpu.memory_space<vmem>>, vector<32x32xbf16>
    %cst_9 = arith.constant dense<0.000000e+00> : vector<32x128xf32>
    %11 = tpu.matmul %10, %9, %cst_9 {dimension_numbers = #tpu.dot_dimension_numbers<[1], [0], [0], [1], [0, 0, 1, 1], [], []>} : vector<32x32xbf16>, vector<32x128xbf16>, vector<32x128xf32> -> vector<32x128xf32>
    %c0_10 = arith.constant 0 : index
    %c0_11 = arith.constant 0 : index
    %12 = vector.load %arg4[%c0_10, %c0_11] : memref<32x8xbf16, #tpu.memory_space<vmem>>, vector<32x8xbf16>
    %cst_12 = arith.constant dense<0.000000e+00> : vector<32x128xf32>
    %13 = tpu.matmul %12, %1, %cst_12 {dimension_numbers = #tpu.dot_dimension_numbers<[1], [0], [0], [1], [0, 0, 1, 1], [], []>} : vector<32x8xbf16>, vector<8x128xbf16>, vector<32x128xf32> -> vector<32x128xf32>
    %14 = arith.addf %11, %13 : vector<32x128xf32>
    %c0_13 = arith.constant 0 : index
    %c0_14 = arith.constant 0 : index
    %15 = vector.load %arg7[%c0_13, %c0_14] : memref<32x1xf32, #tpu.memory_space<vmem>>, vector<32x1xf32>
    %16 = vector.broadcast %15 : vector<32x1xf32> to vector<32x128xf32>
    %17 = arith.addf %14, %16 : vector<32x128xf32>
    %cst_15 = arith.constant 0.000000e+00 : f32
    %18 = vector.broadcast %cst_15 : f32 to vector<32x128xf32>
    %19 = arith.maximumf %17, %18 : vector<32x128xf32>
    %c0_16 = arith.constant 0 : index
    %c0_17 = arith.constant 0 : index
    %20 = vector.load %arg5[%c0_16, %c0_17] : memref<32x1xf32, #tpu.memory_space<vmem>>, vector<32x1xf32>
    %21 = vector.broadcast %20 : vector<32x1xf32> to vector<32x128xf32>
    %22 = arith.mulf %19, %21 : vector<32x128xf32>
    %cst_18 = arith.constant dense<0.000000e+00> : vector<128xf32>
    %23 = vector.multi_reduction <add>, %22, %cst_18 [0] : vector<32x128xf32> to vector<128xf32>
    %24 = vector.shape_cast %23 : vector<128xf32> to vector<1x128xf32>
    %c0_19 = arith.constant 0 : index
    %25 = memref.load %arg8[%c0_19] : memref<1xf32, #tpu.memory_space<smem>>
    %26 = vector.broadcast %25 : f32 to vector<1x128xf32>
    %27 = arith.addf %24, %26 : vector<1x128xf32>
    %c0_20 = arith.constant 0 : index
    %c0_21 = arith.constant 0 : index
    %28 = vector.load %arg9[%c0_20, %c0_21] : memref<1x128xf32, #tpu.memory_space<vmem>>, vector<1x128xf32>
    tpu.vector_store %arg9[%c0_20, %c0_21], %27 {strides = array<i32>} : memref<1x128xf32, #tpu.memory_space<vmem>>, vector<1x128xf32>,
    return
  }
  func.func @transform_0(%arg0: i32) -> (i32, i32) {
    %c0_i32 = arith.constant 0 : i32
    %c0_i32_0 = arith.constant 0 : i32
    return %c0_i32, %arg0 : i32, i32
  }
  func.func @transform_1(%arg0: i32) -> (i32, i32) {
    %c0_i32 = arith.constant 0 : i32
    %c0_i32_0 = arith.constant 0 : i32
    %c0_i32_1 = arith.constant 0 : i32
    return %c0_i32, %c0_i32_0 : i32, i32
  }
  func.func @transform_2(%arg0: i32) -> (i32, i32) {
    %c0_i32 = arith.constant 0 : i32
    %c0_i32_0 = arith.constant 0 : i32
    %c0_i32_1 = arith.constant 0 : i32
    return %c0_i32, %c0_i32_0 : i32, i32
  }
  func.func @transform_3(%arg0: i32) -> (i32, i32) {
    %c0_i32 = arith.constant 0 : i32
    %c0_i32_0 = arith.constant 0 : i32
    %c0_i32_1 = arith.constant 0 : i32
    return %c0_i32, %c0_i32_0 : i32, i32
  }
  func.func @transform_4(%arg0: i32) -> (i32, i32) {
    %c0_i32 = arith.constant 0 : i32
    %c0_i32_0 = arith.constant 0 : i32
    %c0_i32_1 = arith.constant 0 : i32
    return %c0_i32, %c0_i32_0 : i32, i32
  }
  func.func @transform_5(%arg0: i32) -> (i32, i32) {
    %c0_i32 = arith.constant 0 : i32
    %c0_i32_0 = arith.constant 0 : i32
    %c0_i32_1 = arith.constant 0 : i32
    return %c0_i32, %c0_i32_0 : i32, i32
  }
  func.func @transform_6(%arg0: i32) -> (i32, i32) {
    %c0_i32 = arith.constant 0 : i32
    %c0_i32_0 = arith.constant 0 : i32
    %c0_i32_1 = arith.constant 0 : i32
    return %c0_i32, %c0_i32_0 : i32, i32
  }
  func.func @transform_7(%arg0: i32) -> i32 {
    %c0_i32 = arith.constant 0 : i32
    %c0_i32_0 = arith.constant 0 : i32
    return %c0_i32 : i32
  }
  func.func @transform_8(%arg0: i32) -> (i32, i32) {
    %c0_i32 = arith.constant 0 : i32
    %c0_i32_0 = arith.constant 0 : i32
    return %c0_i32, %arg0 : i32, i32
  }
}

</mosaic_0001>

<bundles_post_ra>
// kernel: tpu_custom_call.1
= control target key start
LH: loop header
LB: loop body
LE: loop exit
PB: predicated region body
PF: predicated region fallthrough
CT: control target
= control target key end

     0   :  { %vm79_vm0 = vcmask 130048   ;;  %v455_v3 = vmov 0   ;;  %s579_s0 = inlined_call_operand.vmem [shape: bf16[24,128], index: 0, kind: input, shape index: {}]   ;;  %s580_s1 = inlined_call_operand.vmem [shape: bf16[32,16], index: 1, kind: input, shape index: {}]   ;;  %s581_s2 = inlined_call_operand.vmem [shape: bf16[32,32], index: 2, kind: input, shape index: {}]   ;;  %s582_s3 = inlined_call_operand.vmem [shape: bf16[32,8], index: 3, kind: input, shape index: {}]   ;;  %s583_s4 = inlined_call_operand.vmem [shape: f32[32,1], index: 4, kind: input, shape index: {}]   ;;  %s584_s5 = inlined_call_operand.vmem [shape: f32[32,1], index: 5, kind: input, shape index: {}]   ;;  %s585_s6 = inlined_call_operand.vmem [shape: f32[32,1], index: 6, kind: input, shape index: {}]   ;;  %s586_s7 = inlined_call_operand.<no memory space> [shape: f32[1], index: 7, kind: input, shape index: {}]   ;;  %s587_s8 = inlined_call_operand.hbm [shape: f32[1,128], index: 8, kind: output, shape index: {}]  }
   0x1   :  { %v424_v0 = vld [vmem:[%s579_s0] sm:$0xff]   ;;  %v426_v2 = vld [vmem:[%s580_s1 + $0x8] sm:$0xff]   ;;  %422 = vset.pattern.permute.xlu0 %v455_v3  ;;  %v41_v5 = vld [vmem:[%s584_s5 + $0x10] sm:$0xff]  ;;  %423 = vset.pattern.permute.xlu1 %v455_v3 }
   0x2   :  { %v425_v1 = vld [vmem:[%s580_s1] sm:$0xff]   ;;  %395 = vmatprep.subr.bf16.mxu0 %v424_v0  ;;  %v40_v6 = vld [vmem:[%s584_s5 + $0x8] sm:$0xff]  ;;  %55 = vperm.xlu1 %423, %v41_v5   ;;  %v42_v7 = vld [vmem:[%s584_s5 + $0x18] sm:$0xff] }
   0x3   :  { %396 = vmatpush3.bf16.msra.mxu0 %v424_v0  ;;  %397 = vmatprep.mubr.msk.bf16.mxu0 %vm79_vm0, %v425_v1  ;;  %v39_v4 = vld [vmem:[%s584_s5] sm:$0xff] }
   0x4   :  { %45 = vperm.xlu0 %422, %v39_v4   ;;  %v285_v8 = vld [vmem:[%s585_s6] sm:$0xff] }
   0x6   :  { %398 = vmatmul.mubr.msk.bf16.vlgmr.msra.gmra.mrb[0].mxu0 %vm79_vm0, %v426_v2  ;;  %60 = vperm.xlu1 %423, %v42_v7  }
   0x8   :  { %50 = vperm.xlu0 %422, %v40_v6  }
   0x9   :  { %14 = vsyncpa [#allocation4], 0  ;;  %v286_v9 = vld [vmem:[%s585_s6 + $0x8] sm:$0xff]  ;;  %v287_v10 = vld [vmem:[%s585_s6 + $0x10] sm:$0xff]  ;;  %vm166_vm1 = vcmask 1043456   ;;  %vm159_vm2 = vcmask 64512  }
   0xa   :  { %296 = vperm.xlu1 %423, %v286_v9   ;;  %v288_v11 = vld [vmem:[%s585_s6 + $0x18] sm:$0xff]  ;;  %v317_v12 = vld [vmem:[%s583_s4] sm:$0xff]  ;;  %v318_v13 = vld [vmem:[%s583_s4 + $0x8] sm:$0xff]  ;;  %vm229_vm3 = vcmask 261120   ;;  %s456_s17 = smov [#allocation3]  }
   0xb   :  { %v319_v14 = vld [vmem:[%s583_s4 + $0x10] sm:$0xff]  ;;  %v320_v15 = vld [vmem:[%s583_s4 + $0x18] sm:$0xff]  ;;  %v34_v16 = vld [vmem:[%s579_s0 + $0x8] sm:$0xf]  ;;  %s364_s18 = sshll.u32 %s456_s17, 4  ;;  %s365_s18 = int_to_ptr.vmem [resolvable:$true] %s364_s18 }
   0xc   :  { %291 = vperm.xlu0 %422, %v285_v8   ;;  %419 = vmatprep.subr.msk.bf16.mxu1 %vm166_vm1, %v34_v16  ;;  %v168_v17 = vsel %vm166_vm1, %v34_v16, 0  ;;  %v427_v18 = vld [vmem:[%s582_s3] sm:$0xff]   ;;  %v428_v19 = vld [vmem:[%s582_s3 + $0x8] sm:$0xff]   ;;  %v355_v8 = vstv %s586_s7  ;;  %s431_s19 = scalar_lea.vmem %s365_s18, 16  ;;  %s435_s20 = scalar_lea.vmem %s365_s18, 32 }
   0xd   :  { %402 = vmatpush3.bf16.msra.mxu1 %v168_v17  ;;  %403 = vmatprep.mubr.msk.bf16.mxu1 %vm159_vm2, %v427_v18  ;;  %v429_v20 = vld [vmem:[%s581_s2] sm:$0xff]   ;;  %v430_v39 = vld [vmem:[%s581_s2 + $0x8] sm:$0xff]   ;;  %p432_p0 = scmp.ne.s32.totalorder %s365_s18, %s431_s19  ;;  %p436_p1 = scmp.lt.s32.totalorder %s365_s18, %s365_s18 }
   0xe   :  { %306 = vperm.xlu1 %423, %v288_v11   ;;  %p437_p2 = scmp.lt.s32.totalorder %s435_s20, %s431_s19 }
  0x10   :  { %301 = vperm.xlu0 %422, %v287_v10   ;;  %404 = vmatmul.mubr.msk.bf16.vlgmr.msra.gmra.mrb[0].mxu1 %vm159_vm2, %v428_v19  ;;  %p438_p3 = por %p437_p2, %p436_p1 }
  0x11   :  { %411 = vmatprep.mubr.msk.bf16.mxu1 %vm229_vm3, %v429_v20 }
  0x12   :  { %328 = vperm.xlu1 %423, %v318_v13   ;;  %p439_p4 = pnand %p438_p3, %p432_p0 }
  0x14   :  { %323 = vperm.xlu0 %422, %v317_v12  }
  0x16   :  { %338 = vperm.xlu1 %423, %v320_v15  }
  0x18   :  { %333 = vperm.xlu0 %422, %v319_v14  }
  0x81   :  { %v56_v21 = vpop.permute.xlu1 %55 }
  0x83   :  { %v46_v22 = vpop.permute.xlu0 %45 }
  0x85   :  { %v61_v26 = vpop.permute.xlu1 %60 }
  0x87   :  { %v51_v29 = vpop.permute.xlu0 %50 }
  0x89   :  { %v297_v41 = vpop.permute.xlu1 %296 }
  0x8b   :  { %v292_v40 = vpop.permute.xlu0 %291 }
  0x8d   :  { %v307_v43 = vpop.permute.xlu1 %306 }
  0x8f   :  { %v302_v42 = vpop.permute.xlu0 %301 }
  0x91   :  { %v329_v54 = vpop.permute.xlu1 %328 }
  0x93   :  { %v324_v49 = vpop.permute.xlu0 %323 }
  0x95   :  { %v339_v63 = vpop.permute.xlu1 %338 }
  0x97   :  { %v334_v60 = vpop.permute.xlu0 %333 }
  0xd9   :  { %v399_v23 = vpop.f32.mrb[0].mxu0 }
  0xda   :  { %v129_v24 = vadd.f32 %v399_v23, %v56_v21  ;;  %v120_v25 = vpop.f32.mrb[1].mxu0 }
  0xdb   :  { %v121_v27 = vadd.f32 %v120_v25, %v46_v22  ;;  %v400_v28 = vpop.f32.mrb[2].mxu0 }
  0xdc   :  { %v132_v30 = vadd.f32 %v400_v28, %v61_v26  ;;  %v123_v31 = vpop.f32.mrb[3].mxu0  ;;  %v137_v33 = vmax.f32 %v129_v24, 0.0 }
  0xdd   :  { %v124_v32 = vadd.f32 %v123_v31, %v51_v29  ;;  %v135_v35 = vmax.f32 %v121_v27, 0.0 }
  0xde   :  { %v138_v34 = vmax.f32 %v132_v30, 0.0 }
  0xdf   :  { %v136_v36 = vmax.f32 %v124_v32, 0.0 }
  0xe0   :  { %v140_v37 = vpack.c.bf16 %v138_v34, %v137_v33 }
  0xe1   :  { %v139_v38 = vpack.c.bf16 %v136_v36, %v135_v35 }
  0xe3   :  { %407 = vmatprep.subr.bf16.mxu1 %v139_v38 }
  0xe4   :  { %408 = vmatpush3.bf16.msra.mxu1 %v139_v38 }
  0xe5   :  { %409 = vmatprep.subr.bf16.mxu1 %v140_v37 }
  0xe8   :  { %410 = vmatpush3.bf16.msra.mxu1 %v140_v37 }
  0xeb   :  { %412 = vmatmul.mubr.msk.bf16.vlgmr.msra.gmra.mrb[0].mxu1 %vm229_vm3, %v430_v39 }
 0x1be   :  { %v413_v44 = vpop.f32.mrb[0].mxu1 }
 0x1bf   :  { %v270_v45 = vpop.f32.mrb[1].mxu1  ;;  %v311_v46 = vadd.f32 %v413_v44, %v302_v42 }
 0x1c0   :  { %v309_v47 = vadd.f32 %v292_v40, %v270_v45  ;;  %v414_v48 = vpop.f32.mrb[2].mxu1 }
 0x1c1   :  { %v273_v50 = vpop.f32.mrb[3].mxu1  ;;  %v312_v52 = vadd.f32 %v414_v48, %v307_v43  ;;  %v315_v55 = vmax.f32 %v311_v46, 0.0 }
 0x1c2   :  { %v313_v51 = vmax.f32 %v309_v47, 0.0  ;;  %v310_v53 = vadd.f32 %v297_v41, %v273_v50 }
 0x1c3   :  { %v316_v58 = vmax.f32 %v312_v52, 0.0  ;;  %v343_v61 = vmul.f32 %v334_v60, %v315_v55 }
 0x1c4   :  { %v314_v56 = vmax.f32 %v310_v53, 0.0  ;;  %v341_v57 = vmul.f32 %v324_v49, %v313_v51 }
 0x1c5   :  { %v344_v0 = vmul.f32 %v339_v63, %v316_v58 }
 0x1c6   :  { %v342_v59 = vmul.f32 %v329_v54, %v314_v56 }
 0x1c8   :  { %v345_v62 = vadd.f32 %v342_v59, %v341_v57 }
 0x1ca   :  { %v346_v1 = vadd.f32 %v345_v62, %v343_v61 }
 0x1cc   :  { %v347_v2 = vadd.f32 %v346_v1, %v344_v0 }
 0x1ce   :  { %v348_v3 = vrot.slane %v347_v2, 4 }
 0x1d0   :  { %v349_v4 = vadd.f32 %v348_v3, %v347_v2 }
 0x1d2   :  { %v350_v5 = vrot.slane %v349_v4, 2 }
 0x1d4   :  { %v351_v6 = vadd.f32 %v350_v5, %v349_v4 }
 0x1d6   :  { %v352_v7 = vrot.slane %v351_v6, 1 }
 0x1d8   :  { %v353_v9 = vadd.f32 %v352_v7, %v351_v6 }
 0x1da   :  { %v356_v10 = vadd.f32 %v355_v8, %v353_v9 }
 0x1dc   :  { %357 = vst [vmem:[#allocation3] sm:$0x1] %v356_v10 }
 0x1dd   :  { %442 = shalt.err (!%p439_p4)
}
 0x1de   :  { %s443_s23 = scalar_lea.hbm %s587_s8, 16 }
 0x1df   :  { %p444_p5 = scmp.ne.s32.totalorder %s587_s8, %s443_s23  ;;  %p447_p6 = scmp.lt.u32.totalorder %s443_s23, %s587_s8 }
 0x1e1   :  { %p449_p7 = pnand %p447_p6, %p444_p5 }
 0x1e3   :  { %452 = shalt.err (!%p449_p7)
}
 0x1e4   :  { %367 = dma.vmem_to_hbm [thread:$0]  %s365_s18, 16, %s587_s8, [#allocation4]  }
 0x1e5   :  { %453 = dma.done.wait [#allocation4], 16  }
 0x1e6   :  { %454 = vsyncadd [#allocation4], 4294967280 }
 0x1e7   :  { %371 = vsyncpa [#allocation4], 1 }

</bundles_post_ra>
